<compile_context>
chip_gen: v5e
topology: v5e:2x2
jax: 0.10.0
libtpu: 0.0.40
codegen_flags: <defaults>
</compile_context>

<pallas_src>
import functools

import numpy as np
import jax
import jax.numpy as jnp
from jax.experimental import pallas as pl
from jax.experimental.pallas import tpu as pltpu


# ----------------------------------------------------------------------------
# Pallas kernel: grid = (B tiles ["parallel"], C tiles ["arbitrary", last]).
# ----------------------------------------------------------------------------
def _tsa_kernel(x_ref, p_ref, wa_ref, wb_ref, out_ref, acc_ref, *,
                inv_c, c_total):
    c = pl.program_id(1)

    two_bt_al, hw = acc_ref.shape
    bt_al = two_bt_al // 2          # sublane-aligned row offset of the sum half
    bt = x_ref.shape[0]             # actual batch rows in this tile
    ct = x_ref.shape[1]             # channels per tile (static)

    x = x_ref[...].astype(jnp.float32)                     # (bt, ct, hw)

    # Mask the ragged C tail tile (static branch: free when C % ct == 0).
    if c_total % ct != 0:
        valid = c_total - c * ct
        ch = jax.lax.broadcasted_iota(jnp.int32, x.shape, 1)
        m = ch < valid
        x_max_in = jnp.where(m, x, jnp.float32(-jnp.inf))
        x_sum_in = jnp.where(m, x, jnp.float32(0.0))
    else:
        x_max_in = x
        x_sum_in = x

    tile_max = jnp.max(x_max_in, axis=1)                   # (bt, hw)
    tile_sum = jnp.sum(x_sum_in, axis=1)                   # (bt, hw)

    @pl.when(c == 0)
    def _():
        acc_ref[:bt_al, :] = jnp.full((bt_al, hw), -jnp.inf, jnp.float32)
        acc_ref[bt_al:, :] = jnp.zeros((bt_al, hw), jnp.float32)

    acc_ref[:bt, :] = jnp.maximum(acc_ref[:bt, :], tile_max)
    acc_ref[bt_al:bt_al + bt, :] = acc_ref[bt_al:bt_al + bt, :] + tile_sum

    # Epilogue once per B tile: both adaptive pools in one matmul, fused
    # block-diagonal SE MLPs, sigmoid, one lane-contiguous (bt, 14) store.
    @pl.when(c == pl.num_programs(1) - 1)
    def _():
        pooled = jnp.dot(acc_ref[...], p_ref[...],
                         preferred_element_type=jnp.float32)   # (2*bt_al, 14)
        # Apply the 1/C "mean" scale only to the pooled sum rows (bt x 14).
        row = jax.lax.broadcasted_iota(jnp.int32, pooled.shape, 0)
        pooled = jnp.where(row < bt_al, pooled, pooled * jnp.float32(inv_c))
        h = jnp.maximum(jnp.dot(pooled, wa_ref[...],
                                preferred_element_type=jnp.float32), 0.0)
        o = jnp.dot(h, wb_ref[...],
                    preferred_element_type=jnp.float32)        # (2*bt_al, 14)
        out_ref[...] = jax.nn.sigmoid(o[:bt] + o[bt_al:bt_al + bt])


# ----------------------------------------------------------------------------
# Host-side helpers.
# ----------------------------------------------------------------------------
@functools.lru_cache(maxsize=None)
def _combined_pool_matrix(H, W):
    """(H*W, 14) matrix: cols 0:7 = AdaptiveAvgPool2d((1,7)) over flattened
    (H,W); cols 7:14 = AdaptiveAvgPool2d((7,1)).  Exact PyTorch bin rule."""
    def bins(n):
        m = np.zeros((n, 7), np.float32)
        for j in range(7):
            s = (j * n) // 7
            e = -(-((j + 1) * n) // 7)          # ceil
            m[s:e, j] = 1.0 / (e - s)
        return m
    pw = bins(W)                                 # (W, 7)
    ph = bins(H)                                 # (H, 7)
    p_1x7 = np.kron(np.ones((H, 1), np.float32) / H, pw)   # (H*W, 7)
    p_7x1 = np.kron(ph, np.ones((W, 1), np.float32) / W)   # (H*W, 7)
    return jnp.asarray(np.concatenate([p_1x7, p_7x1], axis=1))


def _vmem_capacity_bytes():
    try:
        return int(pltpu.get_tpu_info().vmem_capacity_bytes)
    except Exception:
        return 64 * 1024 * 1024      # conservative (v7x-sized) fallback


def _sublane_multiple(dtype):
    """Native sublane granularity: f32 -> 8, bf16/f16 -> 16, int8/fp8 -> 32."""
    return 8 * max(1, 4 // jnp.dtype(dtype).itemsize)


def _pick_bt(B):
    """Batch tile: full B when tiny; otherwise a multiple of 8 chosen so the
    'parallel' B axis has >= 2 blocks (keeps both v7x TensorCores busy)."""
    if B <= 8:
        # NOTE: nb == 1 here; for tiny B on v7x the C reduction could be split
        # across cores with a combine step -- not worth the complexity here.
        return B
    return min(32, max(8, ((B // 2) // 8) * 8))


def _pick_ct(C, cap, sub):
    """Channel tile: full C if it fits the per-block budget; otherwise the
    largest multiple of `sub` <= cap, preferring (within 2x of the cap) a
    divisor of C so the tail tile needs no masking."""
    if C <= cap:
        return C
    t = max(sub, (cap // sub) * sub)
    cand = t
    while cand >= max(sub, t // 2):
        if C % cand == 0:
            return cand
        cand -= sub
    return t        # non-divisor; ragged tail is masked in-kernel


def _round_up(n, m):
    return ((n + m - 1) // m) * m


# ----------------------------------------------------------------------------
# Wrapper.
# ----------------------------------------------------------------------------
def time_spectrum_attention(x, w11t, w12t, w21t, w22t, *, bt=None, ct=None):
    B, C, H, W = x.shape
    HW = H * W
    x_flat = x.reshape(B, C, HW)                 # native dtype, lane-dense HW

    p = _combined_pool_matrix(H, W)              # cached per (H, W)

    # Block-diagonal SE weights: se1 top-left, se2 bottom-right (bias-free).
    wa = (jnp.zeros((14, 8), jnp.float32)
          .at[:7, :4].set(w11t).at[7:, 4:].set(w21t))      # 7->4 (both SEs)
    wb = (jnp.zeros((8, 14), jnp.float32)
          .at[:4, :7].set(w12t).at[4:, 7:].set(w22t))      # 4->7 (both SEs)

    elem = jnp.dtype(x.dtype).itemsize
    sub = _sublane_multiple(x.dtype)

    vmem_cap = _vmem_capacity_bytes()
    # 48 MiB scoped limit on v7x (64 MiB VMEM/TC), 64 MiB on v5e/v6e (128 MiB).
    vmem_limit = int(min(vmem_cap * 3 // 4, 64 * 1024 * 1024))
    # ~10.7 MiB x-blocks on v7x, 12 MiB on v5e/v6e (x2 for double-buffering).
    block_budget = int(min(vmem_cap // 6, 12 * 1024 * 1024))

    if bt is None:
        bt = _pick_bt(B)
    if ct is None:
        cap_ch = max(sub, block_budget // max(1, bt * HW * elem))
        ct = _pick_ct(C, cap_ch, sub)

    bt_al = _round_up(bt, 8)                     # aligned offset of the sum half
    nb, nc = pl.cdiv(B, bt), pl.cdiv(C, ct)

    cost = pl.CostEstimate(
        flops=int(2 * B * C * HW + 4 * B * HW * 14),
        transcendentals=int(B * 14),
        bytes_accessed=int(B * C * HW * elem + HW * 14 * 4
                           + (14 * 8 + 8 * 14) * 4 + B * 14 * 4),
    )

    # NOTE: if profiling shows exposed DMA gaps with many C steps, the x
    # BlockSpec could use pipeline_mode=pl.Buffered(3); left at the default
    # double-buffering to stay well within the v7x 64 MiB VMEM.
    out = pl.pallas_call(
        functools.partial(_tsa_kernel, inv_c=1.0 / C, c_total=C),
        out_shape=jax.ShapeDtypeStruct((B, 14), jnp.float32),
        grid=(nb, nc),
        in_specs=[
            pl.BlockSpec((bt, ct, HW), lambda b, c: (b, c, 0)),   # x tiles
            pl.BlockSpec((HW, 14), lambda b, c: (0, 0)),          # pool matrix
            pl.BlockSpec((14, 8), lambda b, c: (0, 0)),           # SE layer 1
            pl.BlockSpec((8, 14), lambda b, c: (0, 0)),           # SE layer 2
        ],
        out_specs=pl.BlockSpec((bt, 14), lambda b, c: (b, 0)),
        scratch_shapes=[pltpu.VMEM((2 * bt_al, HW), jnp.float32)],  # max | sum
        compiler_params=pltpu.CompilerParams(
            dimension_semantics=("parallel", "arbitrary"),
            vmem_limit_bytes=vmem_limit),
        cost_estimate=cost,
    )(x_flat, p, wa, wb)

    return {'dim1': out[:, :7].reshape(B, 1, 1, 7),
            'dim2': out[:, 7:].reshape(B, 1, 7, 1)}


# ----------------------------------------------------------------------------
# Pure-JAX reference (mirrors the PyTorch forward) for a correctness check.
# ----------------------------------------------------------------------------
def _reference(x, w11t, w12t, w21t, w22t):
    B, C, H, W = x.shape
    max_r = jnp.max(x, axis=1)    # (B, H, W)
    avg_r = jnp.mean(x, axis=1)

    def pool_1x7(a):  # mean over H, adaptive 7 bins over W -> (B, 7)
        cols = []
        for j in range(7):
            s = (j * W) // 7
            e = -(-((j + 1) * W) // 7)
            cols.append(a[:, :, s:e].mean(axis=(1, 2)))
        return jnp.stack(cols, axis=1)

    def pool_7x1(a):  # adaptive 7 bins over H, mean over W -> (B, 7)
        rows = []
        for j in range(7):
            s = (j * H) // 7
            e = -(-((j + 1) * H) // 7)
            rows.append(a[:, s:e, :].mean(axis=(1, 2)))
        return jnp.stack(rows, axis=1)

    def se(v, wa, wb):
        return jnp.maximum(v @ wa, 0.0) @ wb

    dim1 = jax.nn.sigmoid(se(pool_1x7(max_r), w11t, w12t) +
                          se(pool_1x7(avg_r), w11t, w12t))
    dim2 = jax.nn.sigmoid(se(pool_7x1(max_r), w21t, w22t) +
                          se(pool_7x1(avg_r), w21t, w22t))
    return {'dim1': dim1.reshape(B, 1, 1, 7),
            'dim2': dim2.reshape(B, 1, 7, 1)}


if __name__ == "__main__":
    key = jax.random.PRNGKey(0)
    kx, k1, k2, k3, k4 = jax.random.split(key, 5)

    # Small shapes consistent with the module.
    B, C, H, W = 2, 4, 16, 16
    x = jax.random.normal(kx, (B, C, H, W), jnp.float32)

    # PyTorch 1x1 Conv2d weights (no bias):
    #   se*.conv1: (4, 7, 1, 1)   se*.conv2: (7, 4, 1, 1)
    # Passed transposed so the MLP is v @ W^T.
    w_se1_a = jax.random.normal(k1, (4, 7), jnp.float32) * 0.3
    w_se1_b = jax.random.normal(k2, (7, 4), jnp.float32) * 0.3
    w_se2_a = jax.random.normal(k3, (4, 7), jnp.float32) * 0.3
    w_se2_b = jax.random.normal(k4, (7, 4), jnp.float32) * 0.3
    w11t, w12t = w_se1_a.T, w_se1_b.T       # (7,4), (4,7)
    w21t, w22t = w_se2_a.T, w_se2_b.T       # (7,4), (4,7)

    # --- Run 1: f32 input, auto tiling (single C step). ---
    ref = _reference(x, w11t, w12t, w21t, w22t)
    out = time_spectrum_attention(x, w11t, w12t, w21t, w22t)
    jax.block_until_ready(out)
    np.testing.assert_allclose(np.asarray(out['dim1']), np.asarray(ref['dim1']),
                               rtol=2e-5, atol=2e-5)
    np.testing.assert_allclose(np.asarray(out['dim2']), np.asarray(ref['dim2']),
                               rtol=2e-5, atol=2e-5)
    assert out['dim1'].shape == (B, 1, 1, 7)
    assert out['dim2'].shape == (B, 1, 7, 1)

    # --- Run 2: bf16 input streamed natively, ragged B and C, forced multi-step
    # C reduction -> exercises accumulator init/finalize, C-tail masking, and
    # the ragged-B output-drop path. ---
    B2, C2 = 10, 20
    x2 = jax.random.normal(kx, (B2, C2, H, W), jnp.float32).astype(jnp.bfloat16)
    ref2 = _reference(x2.astype(jnp.float32), w11t, w12t, w21t, w22t)
    out2 = time_spectrum_attention(x2, w11t, w12t, w21t, w22t, ct=16)
    jax.block_until_ready(out2)
    np.testing.assert_allclose(np.asarray(out2['dim1']), np.asarray(ref2['dim1']),
                               rtol=1e-4, atol=1e-4)
    np.testing.assert_allclose(np.asarray(out2['dim2']), np.asarray(ref2['dim2']),
                               rtol=1e-4, atol=1e-4)
    assert out2['dim1'].shape == (B2, 1, 1, 7)
    assert out2['dim2'].shape == (B2, 1, 7, 1)

    print("KERNEL_OK")
</pallas_src>

<mosaic_0001>
module attributes {stable_mosaic.version = 11 : i64} {
  func.func @_tsa_kernel(%arg0: i32, %arg1: i32, %arg2: memref<2x4x256xf32, #tpu.memory_space<vmem>>, %arg3: memref<256x14xf32, #tpu.memory_space<vmem>>, %arg4: memref<14x8xf32, #tpu.memory_space<vmem>>, %arg5: memref<8x14xf32, #tpu.memory_space<vmem>>, %arg6: memref<2x14xf32, #tpu.memory_space<vmem>>, %arg7: memref<16x256xf32, #tpu.memory_space<vmem>>) attributes {dimension_semantics = [#tpu.dimension_semantics<parallel>, #tpu.dimension_semantics<arbitrary>], iteration_bounds = array<i64: 1, 1>, scalar_prefetch = 0 : i64, scratch_operands = 1 : i64, tpu.core_type = #tpu.core_type<tc>, window_params = [{transform_indices = @transform_0, window_bounds = array<i64: 2, 4, 256>}, {pipeline_mode = #tpu.pipeline_mode<synchronous>, transform_indices = @transform_1, window_bounds = array<i64: 256, 14>}, {pipeline_mode = #tpu.pipeline_mode<synchronous>, transform_indices = @transform_2, window_bounds = array<i64: 14, 8>}, {pipeline_mode = #tpu.pipeline_mode<synchronous>, transform_indices = @transform_3, window_bounds = array<i64: 8, 14>}, {transform_indices = @transform_4, window_bounds = array<i64: 2, 14>}]} {
    %c0 = arith.constant 0 : index
    %c0_0 = arith.constant 0 : index
    %c0_1 = arith.constant 0 : index
    %0 = vector.load %arg2[%c0, %c0_0, %c0_1] : memref<2x4x256xf32, #tpu.memory_space<vmem>>, vector<2x4x256xf32>
    %cst = arith.constant dense<0xFF800000> : vector<2x256xf32>
    %1 = vector.multi_reduction <maximumf>, %0, %cst [1] : vector<2x4x256xf32> to vector<2x256xf32>
    %cst_2 = arith.constant dense<0.000000e+00> : vector<2x256xf32>
    %2 = vector.multi_reduction <add>, %0, %cst_2 [1] : vector<2x4x256xf32> to vector<2x256xf32>
    %c0_i32 = arith.constant 0 : i32
    %3 = arith.cmpi eq, %arg1, %c0_i32 : i32
    %4 = arith.extui %3 : i1 to i32
    %c0_i32_3 = arith.constant 0 : i32
    %5 = arith.cmpi ne, %4, %c0_i32_3 : i32
    scf.if %5 {
      %cst_13 = arith.constant 0xFF800000 : f32
      %15 = vector.broadcast %cst_13 : f32 to vector<8x256xf32>
      %c0_14 = arith.constant 0 : index
      %c0_15 = arith.constant 0 : index
      %16 = vector.load %arg7[%c0_14, %c0_15] : memref<16x256xf32, #tpu.memory_space<vmem>>, vector<8x256xf32>
      tpu.vector_store %arg7[%c0_14, %c0_15], %15 {strides = array<i32>} : memref<16x256xf32, #tpu.memory_space<vmem>>, vector<8x256xf32>,
      %cst_16 = arith.constant 0.000000e+00 : f32
      %17 = vector.broadcast %cst_16 : f32 to vector<8x256xf32>
      %c8_17 = arith.constant 8 : index
      %c0_18 = arith.constant 0 : index
      %18 = vector.load %arg7[%c8_17, %c0_18] : memref<16x256xf32, #tpu.memory_space<vmem>>, vector<8x256xf32>
      tpu.vector_store %arg7[%c8_17, %c0_18], %17 {strides = array<i32>} : memref<16x256xf32, #tpu.memory_space<vmem>>, vector<8x256xf32>,
    } else {
    }
    %c0_4 = arith.constant 0 : index
    %c0_5 = arith.constant 0 : index
    %6 = vector.load %arg7[%c0_4, %c0_5] : memref<16x256xf32, #tpu.memory_space<vmem>>, vector<2x256xf32>
    %7 = arith.maximumf %6, %1 : vector<2x256xf32>
    %c0_6 = arith.constant 0 : index
    %c0_7 = arith.constant 0 : index
    %8 = vector.load %arg7[%c0_6, %c0_7] : memref<16x256xf32, #tpu.memory_space<vmem>>, vector<2x256xf32>
    tpu.vector_store %arg7[%c0_6, %c0_7], %7 {strides = array<i32>} : memref<16x256xf32, #tpu.memory_space<vmem>>, vector<2x256xf32>,
    %c8 = arith.constant 8 : index
    %c0_8 = arith.constant 0 : index
    %9 = vector.load %arg7[%c8, %c0_8] : memref<16x256xf32, #tpu.memory_space<vmem>>, vector<2x256xf32>
    %10 = arith.addf %9, %2 : vector<2x256xf32>
    %c8_9 = arith.constant 8 : index
    %c0_10 = arith.constant 0 : index
    %11 = vector.load %arg7[%c8_9, %c0_10] : memref<16x256xf32, #tpu.memory_space<vmem>>, vector<2x256xf32>
    tpu.vector_store %arg7[%c8_9, %c0_10], %10 {strides = array<i32>} : memref<16x256xf32, #tpu.memory_space<vmem>>, vector<2x256xf32>,
    %c0_i32_11 = arith.constant 0 : i32
    %12 = arith.cmpi eq, %arg1, %c0_i32_11 : i32
    %13 = arith.extui %12 : i1 to i32
    %c0_i32_12 = arith.constant 0 : i32
    %14 = arith.cmpi ne, %13, %c0_i32_12 : i32
    scf.if %14 {
      %c0_13 = arith.constant 0 : index
      %c0_14 = arith.constant 0 : index
      %15 = vector.load %arg7[%c0_13, %c0_14] : memref<16x256xf32, #tpu.memory_space<vmem>>, vector<16x256xf32>
      %c0_15 = arith.constant 0 : index
      %c0_16 = arith.constant 0 : index
      %16 = vector.load %arg3[%c0_15, %c0_16] : memref<256x14xf32, #tpu.memory_space<vmem>>, vector<256x14xf32>
      %cst_17 = arith.constant dense<0.000000e+00> : vector<16x14xf32>
      %17 = tpu.matmul %15, %16, %cst_17 {dimension_numbers = #tpu.dot_dimension_numbers<[1], [0], [0], [1], [0, 0, 1, 1], [], []>} : vector<16x256xf32>, vector<256x14xf32>, vector<16x14xf32> -> vector<16x14xf32>
      %18 = tpu.iota {dimensions = array<i32: 0>} : vector<16x14xi32>
      %c8_i32 = arith.constant 8 : i32
      %19 = vector.broadcast %c8_i32 : i32 to vector<16x14xi32>
      %20 = arith.cmpi slt, %18, %19 : vector<16x14xi32>
      %cst_18 = arith.constant 2.500000e-01 : f32
      %21 = vector.broadcast %cst_18 : f32 to vector<16x14xf32>
      %22 = arith.mulf %17, %21 : vector<16x14xf32>
      %23 = arith.select %20, %17, %22 : vector<16x14xi1>, vector<16x14xf32>
      %c0_19 = arith.constant 0 : index
      %c0_20 = arith.constant 0 : index
      %24 = vector.load %arg4[%c0_19, %c0_20] : memref<14x8xf32, #tpu.memory_space<vmem>>, vector<14x8xf32>
      %cst_21 = arith.constant dense<0.000000e+00> : vector<16x8xf32>
      %25 = tpu.matmul %23, %24, %cst_21 {dimension_numbers = #tpu.dot_dimension_numbers<[1], [0], [0], [1], [0, 0, 1, 1], [], []>} : vector<16x14xf32>, vector<14x8xf32>, vector<16x8xf32> -> vector<16x8xf32>
      %cst_22 = arith.constant 0.000000e+00 : f32
      %26 = vector.broadcast %cst_22 : f32 to vector<16x8xf32>
      %27 = arith.maximumf %25, %26 : vector<16x8xf32>
      %c0_23 = arith.constant 0 : index
      %c0_24 = arith.constant 0 : index
      %28 = vector.load %arg5[%c0_23, %c0_24] : memref<8x14xf32, #tpu.memory_space<vmem>>, vector<8x14xf32>
      %cst_25 = arith.constant dense<0.000000e+00> : vector<16x14xf32>
      %29 = tpu.matmul %27, %28, %cst_25 {dimension_numbers = #tpu.dot_dimension_numbers<[1], [0], [0], [1], [0, 0, 1, 1], [], []>} : vector<16x8xf32>, vector<8x14xf32>, vector<16x14xf32> -> vector<16x14xf32>
      %30 = vector.extract_strided_slice %29 {offsets = [0, 0], sizes = [2, 14], strides = [1, 1]} : vector<16x14xf32> to vector<2x14xf32>
      %31 = vector.extract_strided_slice %29 {offsets = [8, 0], sizes = [2, 14], strides = [1, 1]} : vector<16x14xf32> to vector<2x14xf32>
      %32 = arith.addf %30, %31 : vector<2x14xf32>
      %33 = arith.negf %32 : vector<2x14xf32>
      %34 = math.exp %33 : vector<2x14xf32>
      %cst_26 = arith.constant 1.000000e+00 : f32
      %35 = vector.broadcast %cst_26 : f32 to vector<2x14xf32>
      %36 = arith.addf %35, %34 : vector<2x14xf32>
      %37 = arith.divf %35, %36 : vector<2x14xf32>
      %c0_27 = arith.constant 0 : index
      %c0_28 = arith.constant 0 : index
      %38 = vector.load %arg6[%c0_27, %c0_28] : memref<2x14xf32, #tpu.memory_space<vmem>>, vector<2x14xf32>
      tpu.vector_store %arg6[%c0_27, %c0_28], %37 {strides = array<i32>} : memref<2x14xf32, #tpu.memory_space<vmem>>, vector<2x14xf32>,
    } else {
    }
    return
  }
  func.func @transform_0(%arg0: i32, %arg1: i32) -> (i32, i32, i32) {
    %c0_i32 = arith.constant 0 : i32
    %c0_i32_0 = arith.constant 0 : i32
    return %arg0, %arg1, %c0_i32 : i32, i32, i32
  }
  func.func @transform_1(%arg0: i32, %arg1: i32) -> (i32, i32) {
    %c0_i32 = arith.constant 0 : i32
    %c0_i32_0 = arith.constant 0 : i32
    %c0_i32_1 = arith.constant 0 : i32
    return %c0_i32, %c0_i32_0 : i32, i32
  }
  func.func @transform_2(%arg0: i32, %arg1: i32) -> (i32, i32) {
    %c0_i32 = arith.constant 0 : i32
    %c0_i32_0 = arith.constant 0 : i32
    %c0_i32_1 = arith.constant 0 : i32
    return %c0_i32, %c0_i32_0 : i32, i32
  }
  func.func @transform_3(%arg0: i32, %arg1: i32) -> (i32, i32) {
    %c0_i32 = arith.constant 0 : i32
    %c0_i32_0 = arith.constant 0 : i32
    %c0_i32_1 = arith.constant 0 : i32
    return %c0_i32, %c0_i32_0 : i32, i32
  }
  func.func @transform_4(%arg0: i32, %arg1: i32) -> (i32, i32) {
    %c0_i32 = arith.constant 0 : i32
    %c0_i32_0 = arith.constant 0 : i32
    return %arg0, %c0_i32 : i32, i32
  }
}

</mosaic_0001>

<bundles_post_ra>
// kernel: tpu_custom_call.1
= control target key start
LH: loop header
LB: loop body
LE: loop exit
PB: predicated region body
PF: predicated region fallthrough
CT: control target
= control target key end

     0   :  { %v378_v4 = vmov -inf   ;;  %v379_v9 = vmov 0.0   ;;  %s532_s0 = inlined_call_operand.vmem [shape: f32[2,4,256], index: 0, kind: input, shape index: {}]   ;;  %s533_s1 = inlined_call_operand.vmem [shape: f32[256,14], index: 1, kind: input, shape index: {}]   ;;  %s534_s2 = inlined_call_operand.vmem [shape: f32[14,8], index: 2, kind: input, shape index: {}]   ;;  %s535_s3 = inlined_call_operand.vmem [shape: f32[8,14], index: 3, kind: input, shape index: {}]   ;;  %s536_s4 = inlined_call_operand.hbm [shape: f32[2,14], index: 4, kind: output, shape index: {}]  }
   0x1   :  { %v160_v0 = vld [vmem:[%s533_s1 + $0x78] sm:$0xff]  ;;  %v159_v2 = vld [vmem:[%s533_s1 + $0x70] sm:$0xff]  ;;  %105 = vst [vmem:[#allocation2 + $0x10] sm:$0xff] %v378_v4  ;;  %v158_v5 = vld [vmem:[%s533_s1 + $0x68] sm:$0xff] }
   0x2   :  { %v176_v1 = vld [vmem:[%s533_s1 + $0xf8] sm:$0xff]  ;;  %177 = vmatpush.msra.mxu0 %v160_v0  ;;  %v175_v3 = vld [vmem:[%s533_s1 + $0xf0] sm:$0xff]  ;;  %v174_v6 = vld [vmem:[%s533_s1 + $0xe8] sm:$0xff]  ;;  %106 = vst [vmem:[#allocation2] sm:$0xff] %v378_v4 }
   0x3   :  { %200 = vmatpush.msra.mxu1 %v176_v1  ;;  %v157_v7 = vld [vmem:[%s533_s1 + $0x60] sm:$0xff]  ;;  %107 = vst [vmem:[#allocation2 + $0x18] sm:$0xff] %v379_v9  ;;  %v156_v10 = vld [vmem:[%s533_s1 + $0x58] sm:$0xff]  ;;  %v155_v12 = vld [vmem:[%s533_s1 + $0x50] sm:$0xff] }
   0x4   :  { %178 = vmatpush.msra.mxu0 %v159_v2  ;;  %v173_v8 = vld [vmem:[%s533_s1 + $0xe0] sm:$0xff]  ;;  %v172_v11 = vld [vmem:[%s533_s1 + $0xd8] sm:$0xff]  ;;  %108 = vst [vmem:[#allocation2 + $0x8] sm:$0xff] %v379_v9  ;;  %v171_v13 = vld [vmem:[%s533_s1 + $0xd0] sm:$0xff] }
   0x5   :  { %201 = vmatpush.msra.mxu1 %v175_v3  ;;  %v154_v14 = vld [vmem:[%s533_s1 + $0x48] sm:$0xff]  ;;  %v18_v16 = vld [vmem:[%s532_s0] sm:$0xff] }
   0x6   :  { %179 = vmatpush.msra.mxu0 %v158_v5  ;;  %v170_v15 = vld [vmem:[%s533_s1 + $0xc8] sm:$0xff]  ;;  %22 = vst [vmem:[#allocation1] ss:$2 sm:$0xff] %v18_v16  ;;  %v153_v18 = vld [vmem:[%s533_s1 + $0x40] sm:$0xff] }
   0x7   :  { %202 = vmatpush.msra.mxu1 %v174_v6  ;;  %v19_v17 = vld [vmem:[%s532_s0 + $0x8] sm:$0xff]  ;;  %v169_v19 = vld [vmem:[%s533_s1 + $0xc0] sm:$0xff] }
   0x8   :  { %180 = vmatpush.msra.mxu0 %v157_v7  ;;  %26 = vst [vmem:[#allocation1 + $0x10] ss:$2 sm:$0xff] %v19_v17 }
   0x9   :  { %203 = vmatpush.msra.mxu1 %v173_v8 }
   0xa   :  { %181 = vmatpush.msra.mxu0 %v156_v10 }
   0xb   :  { %204 = vmatpush.msra.mxu1 %v172_v11 }
   0xc   :  { %182 = vmatpush.msra.mxu0 %v155_v12 }
   0xd   :  { %205 = vmatpush.msra.mxu1 %v171_v13 }
   0xe   :  { %183 = vmatpush.msra.mxu0 %v154_v14 }
   0xf   :  { %206 = vmatpush.msra.mxu1 %v170_v15 }
  0x10   :  { %9 = vsyncpa [#allocation4], 0  ;;  %v152_v20 = vld [vmem:[%s533_s1 + $0x38] sm:$0xff]  ;;  %184 = vmatpush.msra.mxu0 %v153_v18  ;;  %v151_v22 = vld [vmem:[%s533_s1 + $0x30] sm:$0xff]  ;;  %vm33_vm0 = vcmask 1043456   ;;  %vm115_vm1 = vcmask 1041409  }
  0x11   :  { %v168_v21 = vld [vmem:[%s533_s1 + $0xb8] sm:$0xff]  ;;  %207 = vmatpush.msra.mxu1 %v169_v19  ;;  %v167_v23 = vld [vmem:[%s533_s1 + $0xb0] sm:$0xff]  ;;  %v150_v24 = vld [vmem:[%s533_s1 + $0x28] sm:$0xff]  ;;  %vm241_vm2 = vcmask 1045504   ;;  %vm234_vm3 = vcmask 113664   ;;  %vm271_vm4 = vcmask 64512  }
  0x12   :  { %185 = vmatpush.msra.mxu0 %v152_v20  ;;  %v166_v25 = vld [vmem:[%s533_s1 + $0xa8] sm:$0xff]  ;;  %v149_v26 = vld [vmem:[%s533_s1 + $0x20] sm:$0xff]  ;;  %v27_v30 = vld.sshfl [vmem:[#allocation1 + $0x10] sm:$0xff pattern:$0x75316420]  ;;  %s330_s10 = sshll.u32 %s536_s4, 4  ;;  %s331_s10 = int_to_ptr.hbm [resolvable:$true] %s330_s10 }
  0x13   :  { %208 = vmatpush.msra.mxu1 %v168_v21  ;;  %v23_v27 = vld.sshfl [vmem:[#allocation1] sm:$0xff pattern:$0x75316420]  ;;  %v24_v28 = vld.sshfl [vmem:[#allocation1 + $0x8] sm:$0xff pattern:$0x75316420] }
  0x14   :  { %186 = vmatpush.msra.mxu0 %v151_v22  ;;  %v165_v29 = vld [vmem:[%s533_s1 + $0xa0] sm:$0xff]  ;;  %v34_v31 = vsel %vm33_vm0, %v23_v27, -inf  ;;  %v41_v32 = vsel %vm33_vm0, %v24_v28, -inf  ;;  %v48_v34 = vsel %vm33_vm0, %v27_v30, -inf  ;;  %62 = vst [vmem:[#allocation1] ss:$2 sm:$0xff] %v18_v16 }
  0x15   :  { %209 = vmatpush.msra.mxu1 %v167_v23  ;;  %v35_v33 = vrot.slane %v34_v31, 4  ;;  %v28_v35 = vld.sshfl [vmem:[#allocation1 + $0x18] sm:$0xff pattern:$0x75316420]  ;;  %v42_v36 = vrot.slane %v41_v32, 4  ;;  %v49_v37 = vrot.slane %v48_v34, 4 }
  0x16   :  { %187 = vmatpush.msra.mxu0 %v150_v24  ;;  %v55_v38 = vsel %vm33_vm0, %v28_v35, -inf  ;;  %v148_v39 = vld [vmem:[%s533_s1 + $0x18] sm:$0xff]  ;;  %66 = vst [vmem:[#allocation1 + $0x10] ss:$2 sm:$0xff] %v19_v17  ;;  %v147_v45 = vld [vmem:[%s533_s1 + $0x10] sm:$0xff]  ;;  %v146_v51 = vld [vmem:[%s533_s1 + $0x8] sm:$0xff] }
  0x17   :  { %210 = vmatpush.msra.mxu1 %v166_v25  ;;  %v164_v40 = vld [vmem:[%s533_s1 + $0x98] sm:$0xff]  ;;  %v36_v41 = vmax.f32 %v34_v31, %v35_v33  ;;  %v43_v42 = vmax.f32 %v41_v32, %v42_v36  ;;  %v56_v43 = vrot.slane %v55_v38, 4  ;;  %v50_v44 = vmax.f32 %v48_v34, %v49_v37  ;;  %v163_v46 = vld [vmem:[%s533_s1 + $0x90] sm:$0xff]  ;;  %v162_v52 = vld [vmem:[%s533_s1 + $0x88] sm:$0xff] }
  0x18   :  { %188 = vmatpush.msra.mxu0 %v149_v26  ;;  %v145_v56 = vld [vmem:[%s533_s1] sm:$0xff]  ;;  %v109_v0 = vld [vmem:[#allocation2 + $0x10] sm:$0x3]  ;;  %v110_v13 = vld [vmem:[#allocation2] sm:$0x3]  ;;  %vm321_vm8 = vcmask 107520  }
  0x19   :  { %211 = vmatpush.msra.mxu1 %v165_v29  ;;  %v37_v47 = vrot.slane %v36_v41, 2  ;;  %v44_v48 = vrot.slane %v43_v42, 2  ;;  %v57_v49 = vmax.f32 %v55_v38, %v56_v43  ;;  %v51_v50 = vrot.slane %v50_v44, 2  ;;  %v161_v58 = vld [vmem:[%s533_s1 + $0x80] sm:$0xff] }
  0x1a   :  { %189 = vmatpush.msra.mxu0 %v148_v39  ;;  %v124_v39 = vld [vmem:[#allocation2 + $0x18] sm:$0x3] }
  0x1b   :  { %212 = vmatpush.msra.mxu1 %v164_v40  ;;  %v38_v53 = vmax.f32 %v36_v41, %v37_v47  ;;  %v45_v54 = vmax.f32 %v43_v42, %v44_v48  ;;  %v58_v55 = vrot.slane %v57_v49, 2  ;;  %v52_v57 = vmax.f32 %v50_v44, %v51_v50  ;;  %v63_v62 = vld.sshfl [vmem:[#allocation1] sm:$0xff pattern:$0x75316420]  ;;  %v125_v47 = vld [vmem:[#allocation2 + $0x8] sm:$0x3] }
  0x1c   :  { %190 = vmatpush.msra.mxu0 %v147_v45  ;;  %v73_v2 = vsel %vm33_vm0, %v63_v62, 0.0  ;;  %v64_v7 = vld.sshfl [vmem:[#allocation1 + $0x8] sm:$0xff pattern:$0x75316420] }
  0x1d   :  { %213 = vmatpush.msra.mxu1 %v163_v46  ;;  %v39_v59 = vrot.slane %v38_v53, 1  ;;  %v46_v60 = vrot.slane %v45_v54, 1  ;;  %v59_v61 = vmax.f32 %v57_v49, %v58_v55  ;;  %v53_v63 = vrot.slane %v52_v57, 1  ;;  %v67_v1 = vld.sshfl [vmem:[#allocation1 + $0x10] sm:$0xff pattern:$0x75316420] }
  0x1e   :  { %191 = vmatpush.msra.mxu0 %v146_v51  ;;  %v74_v6 = vrot.slane %v73_v2, 4  ;;  %v87_v9 = vsel %vm33_vm0, %v67_v1, 0.0  ;;  %v68_v10 = vld.sshfl [vmem:[#allocation1 + $0x18] sm:$0xff pattern:$0x75316420]  ;;  %v80_v11 = vsel %vm33_vm0, %v64_v7, 0.0 }
  0x1f   :  { %214 = vmatpush.msra.mxu1 %v162_v52  ;;  %v40_v3 = vmax.f32 %v38_v53, %v39_v59  ;;  %v47_v4 = vmax.f32 %v45_v54, %v46_v60  ;;  %v60_v5 = vrot.slane %v59_v61, 1  ;;  %v54_v8 = vmax.f32 %v52_v57, %v53_v63  ;;  %v233_v52 = vld [vmem:[%s534_s2 + $0x8] sm:$0x3f]  ;;  %v232_v53 = vld [vmem:[%s534_s2] sm:$0xff]  ;;  %s380_s2 = smov [#allocation3]  }
  0x20   :  { %192 = vmatpush.msra.mxu0 %v145_v56  ;;  %v75_v14 = vadd.f32 %v74_v6, %v73_v2  ;;  %v88_v15 = vrot.slane %v87_v9, 4  ;;  %v81_v16 = vrot.slane %v80_v11, 4  ;;  %v94_v18 = vsel %vm33_vm0, %v68_v10, 0.0  ;;  %339 = vmatpush.msk.msra.mxu2 %vm241_vm2, %v233_v52 }
  0x21   :  { %215 = vmatpush.msra.mxu1 %v161_v58  ;;  %v61_v12 = vmax.f32 %v59_v61, %v60_v5  ;;  %v116_v17 = vsel %vm115_vm1, %v54_v8, %v40_v3  ;;  %v95_v25 = vrot.slane %v94_v18, 4  ;;  %v270_v61 = vld [vmem:[%s535_s3] sm:$0xff]  ;;  %s328_s3 = sshll.u32 %s380_s2, 4  ;;  %s329_s3 = int_to_ptr.vmem [resolvable:$true] %s328_s3 }
  0x22   :  { %v120_v19 = vmax.f32 %v109_v0, %v116_v17  ;;  %v76_v21 = vrot.slane %v75_v14, 2  ;;  %v89_v22 = vadd.f32 %v88_v15, %v87_v9  ;;  %v82_v24 = vadd.f32 %v81_v16, %v80_v11  ;;  %260 = vmatpush.msra.mxu2 %v232_v53  ;;  %293 = vmatpush.msra.mxu3 %v270_v61 }
  0x23   :  { %v117_v20 = vsel %vm115_vm1, %v61_v12, %v47_v4  ;;  %v96_v29 = vadd.f32 %v95_v25, %v94_v18 }
  0x24   :  { %v121_v23 = vmax.f32 %v110_v13, %v117_v20  ;;  %122 = vst [vmem:[#allocation2 + $0x10] sm:$0x3] %v120_v19  ;;  %v77_v26 = vadd.f32 %v76_v21, %v75_v14  ;;  %v90_v27 = vrot.slane %v89_v22, 2  ;;  %v83_v28 = vrot.slane %v82_v24, 2 }
  0x25   :  { %v97_v33 = vrot.slane %v96_v29, 2 }
  0x26   :  { %123 = vst [vmem:[#allocation2] sm:$0x3] %v121_v23  ;;  %v78_v30 = vrot.slane %v77_v26, 1  ;;  %v91_v31 = vadd.f32 %v90_v27, %v89_v22  ;;  %v84_v32 = vadd.f32 %v83_v28, %v82_v24 }
  0x27   :  { %v98_v37 = vadd.f32 %v97_v33, %v96_v29 }
  0x28   :  { %v79_v34 = vadd.f32 %v78_v30, %v77_v26  ;;  %v92_v35 = vrot.slane %v91_v31, 1  ;;  %v85_v36 = vrot.slane %v84_v32, 1 }
  0x29   :  { %v99_v42 = vrot.slane %v98_v37, 1 }
  0x2a   :  { %v93_v38 = vadd.f32 %v92_v35, %v91_v31  ;;  %v86_v41 = vadd.f32 %v85_v36, %v84_v32 }
  0x2b   :  { %v141_v40 = vld [vmem:[#allocation2 + $0x10] sm:$0xff]  ;;  %v100_v46 = vadd.f32 %v99_v42, %v98_v37 }
  0x2c   :  { %193 = vmatmul.f32.vlgmr.msra.gmra.mxu0 %v141_v40  ;;  %v130_v44 = vsel %vm115_vm1, %v93_v38, %v79_v34 }
  0x2d   :  { %v142_v43 = vld [vmem:[#allocation2] sm:$0xff]  ;;  %v134_v45 = vadd.f32 %v130_v44, %v124_v39  ;;  %v131_v48 = vsel %vm115_vm1, %v100_v46, %v86_v41 }
  0x2e   :  { %216 = vmatmul.f32.vlgmr.msra.gmra.mxu1 %v142_v43  ;;  %v135_v49 = vadd.f32 %v131_v48, %v125_v47 }
  0x2f   :  { %136 = vst [vmem:[#allocation2 + $0x18] sm:$0x3] %v134_v45 }
  0x30   :  { %137 = vst [vmem:[#allocation2 + $0x8] sm:$0x3] %v135_v49 }
  0x36   :  { %v143_v50 = vld [vmem:[#allocation2 + $0x18] sm:$0xff] }
  0x37   :  { %196 = vmatmul.f32.gmra.mxu0 %v143_v50  ;;  %v144_v51 = vld [vmem:[#allocation2 + $0x8] sm:$0xff] }
  0x38   :  { %219 = vmatmul.f32.gmra.mxu1 %v144_v51 }
  0xa9   :  { %v194_v54 = vpop.f32.mrf.mxu0 }
  0xab   :  { %v217_v55 = vpop.f32.mrf.mxu1 }
  0xac   :  { %v218_v56 = vadd.f32 %v217_v55, %v194_v54 }
  0xae   :  { %340 = vmatmul.msk.f32.vlgmr.msra.gmra.mxu2 %vm234_vm3, %v218_v56 }
  0xb4   :  { %v197_v57 = vpop.f32.mrf.mxu0 }
  0xb5   :  { %v220_v58 = vpop.f32.mrf.mxu1 }
  0xb6   :  { %v221_v59 = vadd.f32 %v220_v58, %v197_v57 }
  0xb8   :  { %v229_v60 = vmul.f32 0.25, %v221_v59 }
  0xba   :  { %341 = vmatmul.msk.f32.gmra.mxu2 %vm234_vm3, %v229_v60 }
 0x131   :  { %v262_v62 = vpop.f32.mrf.mxu2 }
 0x132   :  { %v268_v63 = vmax.f32 %v262_v62, 0.0 }
 0x134   :  { %342 = vmatmul.msk.f32.vlgmr.msra.gmra.mxu3 %vm271_vm4, %v268_v63 }
 0x13d   :  { %v265_v0 = vpop.f32.mrf.mxu2 }
 0x13e   :  { %v269_v1 = vmax.f32 %v265_v0, 0.0 }
 0x140   :  { %343 = vmatmul.msk.f32.gmra.mxu3 %vm271_vm4, %v269_v1 }
 0x1b7   :  { %v295_v2 = vpop.f32.mrf.mxu3 }
 0x1c3   :  { %v298_v3 = vpop.f32.mrf.mxu3 }
 0x1c4   :  { %v301_v4 = vadd.f32 %v298_v3, %v295_v2 }
 0x1c6   :  { %v344_v5 = vmul.f32 -1.442695, %v301_v4 }
 0x1c8   :  { %348 = vpow2.f32 %v344_v5 }
 0x1ce   :  { %v349_v6 = vpop.eup %348 }
 0x1cf   :  { %v305_v7 = vadd.f32 1.0, %v349_v6 }
 0x1d1   :  { %350 = vrcp.f32 %v305_v7  ;;  %v317_v11 = vand.u32 2147483648, %v305_v7  ;;  %v315_v13 = vand.u32 2147483647, %v305_v7  ;;  %vm311_vm6 = vweird.f32 %v305_v7 }
 0x1d3   :  { %v318_v15 = vor.u32 1.1754944e-38, %v317_v11  ;;  %vm316_vm9 = vcmp.eq.f32.partialorder %v315_v13, 8.507059e+37 }
 0x1d7   :  { %v351_v8 = vpop.eup %350 }
 0x1d8   :  { %v307_v9 = vmul.f32 %v351_v8, %v305_v7  ;;  %vm312_vm5 = vweird.f32 %v351_v8 }
 0x1d9   :  { %vm313_vm7 = vmor %vm311_vm6, %vm312_vm5 }
 0x1da   :  { %v308_v10 = vsub.f32 1.0, %v307_v9 }
 0x1dc   :  { %v309_v12 = vmul.f32 %v351_v8, %v308_v10 }
 0x1de   :  { %v310_v14 = vadd.f32 %v351_v8, %v309_v12 }
 0x1e0   :  { %v314_v16 = vsel %vm313_vm7, %v351_v8, %v310_v14 }
 0x1e1   :  { %v319_v17 = vsel %vm316_vm9, %v318_v15, %v314_v16 }
 0x1e2   :  { %322 = vst.msk [vmem:[#allocation3] sm:$0x3] %vm321_vm8, %v319_v17 }
 0x1e3   :  { %333 = dma.vmem_to_hbm [thread:$0]  %s329_s3, 32, %s331_s10, [#allocation4]  }
 0x1e4   :  { %376 = dma.done.wait [#allocation4], 32  }
 0x1e5   :  { %377 = vsyncadd [#allocation4], 4294967264 }
 0x1e6   :  { %338 = vsyncpa [#allocation4], 1 }

</bundles_post_ra>
